<compile_context>
chip_gen: v7x
topology: tpu7x:2x2x1
jax: 0.10.0
libtpu: 0.0.40
codegen_flags: <defaults>
</compile_context>

<pallas_src>
import math
import functools

import jax
import jax.numpy as jnp
from jax.experimental import pallas as pl
from jax.experimental.pallas import tpu as pltpu


# --------------------------------------------------------------------------
# Attention (+ first residual) kernel: grid = (batch, head_group)
# --------------------------------------------------------------------------
def _attn_kernel(x_ref,
                 wq_ref, bq_ref, wk_ref, bk_ref, wv_ref, bv_ref,
                 wo_ref, bo_ref,
                 add_ref,
                 acc_ref, ctx_ref, xb_ref,
                 *, heads_per_group: int, d_head: int):
    gi = pl.program_id(1)
    last_g = pl.num_programs(1) - 1

    # Per-batch init: cast x to bf16 once, seed the accumulator with the
    # residual input plus the output-projection bias.
    @pl.when(gi == 0)
    def _():
        x = x_ref[0]                                  # (L, D) f32
        xb_ref[...] = x.astype(jnp.bfloat16)
        acc_ref[...] = x + bo_ref[...]

    xb = xb_ref[...]                                  # (L, D) bf16

    # Grouped q/k/v projections: (L, D) @ (D, g*dh), full-width MXU matmuls.
    # The 1/sqrt(d_head) scale is already folded into wq/bq.
    q = jnp.dot(xb, wq_ref[0], preferred_element_type=jnp.float32) + bq_ref[0]
    k = jnp.dot(xb, wk_ref[0], preferred_element_type=jnp.float32) + bk_ref[0]
    v = jnp.dot(xb, wv_ref[0], preferred_element_type=jnp.float32) + bv_ref[0]
    qb = q.astype(jnp.bfloat16)
    kb = k.astype(jnp.bfloat16)
    vb = v.astype(jnp.bfloat16)

    # Per-head scaled-dot-product attention inside the group (statically
    # unrolled; g is small).  Per-head context vectors are packed into a
    # (L, g*dh) scratch so the output projection contracts over the full
    # group width in a single matmul.
    for h in range(heads_per_group):
        sl = slice(h * d_head, (h + 1) * d_head)
        q_h, k_h, v_h = qb[:, sl], kb[:, sl], vb[:, sl]
        score = jax.lax.dot_general(q_h, k_h, (((1,), (1,)), ((), ())),
                                    preferred_element_type=jnp.float32)
        score = score - jnp.max(score, axis=-1, keepdims=True)
        p = jnp.exp(score)   # TODO(synk): bf16 exp on v6e/v7x halves EUP work.
        p = p * pl.reciprocal(jnp.sum(p, axis=-1, keepdims=True), approx=True)
        ctx_ref[:, sl] = jnp.dot(p.astype(jnp.bfloat16), v_h,
                                 preferred_element_type=jnp.float32)

    # This group's slice of the output projection, accumulated once per group.
    acc_ref[...] += jnp.dot(ctx_ref[...].astype(jnp.bfloat16), wo_ref[0],
                            preferred_element_type=jnp.float32)

    # After the last group: write add_x = x + MHA(x), lane-dense.
    @pl.when(gi == last_g)
    def _():
        add_ref[0] = acc_ref[...].astype(add_ref.dtype)


# --------------------------------------------------------------------------
# FeedForward (+ second residual) kernel: grid = (row_tiles,)
# --------------------------------------------------------------------------
def _ffn_kernel(a_ref, w1_ref, b1_ref, w2_ref, b2_ref, o_ref):
    a = a_ref[...]                                    # (tr, D) f32 (add_x)
    h1 = jnp.dot(a.astype(jnp.bfloat16), w1_ref[...],
                 preferred_element_type=jnp.float32) + b1_ref[...]
    # TODO(synk): PyTorch nn.GELU default is exact erf; the tanh approximation
    # differs by <~3e-3 per element (covered by the test tolerance).
    h1 = jax.nn.gelu(h1, approximate=True)
    h2 = jnp.dot(h1.astype(jnp.bfloat16), w2_ref[...],
                 preferred_element_type=jnp.float32) + b2_ref[...]
    o_ref[...] = (h2 + a).astype(o_ref.dtype)


# --------------------------------------------------------------------------
# Wrapper
# --------------------------------------------------------------------------
def _vmem_limit_bytes():
    """Per-generation VMEM limit: capacity minus headroom, fallback 48 MiB."""
    try:
        cap = int(pltpu.get_tpu_info().vmem_capacity_bytes)
        return max(32 * 1024 * 1024, cap - 16 * 1024 * 1024)
    except Exception:
        return 48 * 1024 * 1024


def _pick_head_group(n_head: int, d_head: int, target: int = 256) -> int:
    """Smallest divisor g of n_head with g*d_head >= target (cap at n_head)."""
    for g in range(1, n_head + 1):
        if n_head % g == 0 and g * d_head >= target:
            return g
    return n_head


def prepare_encoder_params(params, n_head: int):
    """One-time weight prep: pre-transpose, head-group, bf16 cast, scale-fold.

    Kept out of the per-call path on purpose (runs once at load time).
    """
    D = params["wq"].shape[0]
    hidden = params["w1"].shape[0]
    assert D % n_head == 0
    dh = D // n_head
    g = _pick_head_group(n_head, dh)
    G = n_head // g
    gdh = g * dh
    cdt = jnp.bfloat16
    scale = 1.0 / math.sqrt(dh)

    def group_in_proj(w):                 # (D_out, D_in) -> (G, D_in, g*dh)
        return w.T.reshape(D, G, gdh).transpose(1, 0, 2).astype(cdt)

    prep = {
        "wq": group_in_proj(params["wq"] * scale),
        "bq": (params["bq"] * scale).reshape(G, 1, gdh).astype(jnp.float32),
        "wk": group_in_proj(params["wk"]),
        "bk": params["bk"].reshape(G, 1, gdh).astype(jnp.float32),
        "wv": group_in_proj(params["wv"]),
        "bv": params["bv"].reshape(G, 1, gdh).astype(jnp.float32),
        "wo": params["wo"].T.reshape(G, gdh, D).astype(cdt),   # (G, g*dh, D)
        "bo": params["bo"].reshape(1, D).astype(jnp.float32),
        "w1": params["w1"].T.astype(cdt),                      # (D, hidden)
        "b1": params["b1"].reshape(1, hidden).astype(jnp.float32),
        "w2": params["w2"].T.astype(cdt),                      # (hidden, D)
        "b2": params["b2"].reshape(1, D).astype(jnp.float32),
    }
    meta = dict(n_head=n_head, d_head=dh, heads_per_group=g, n_groups=G,
                d_model=D, hidden=hidden)
    return prep, meta


def encoder_layer_forward(x, prep, meta, s_mask=None):
    """x: (B, L, D) float32; prep/meta from prepare_encoder_params."""
    assert s_mask is None, "mask path not implemented"  # TODO(synk): s_mask
    B, L, D = x.shape
    G = meta["n_groups"]
    g = meta["heads_per_group"]
    dh = meta["d_head"]
    gdh = g * dh
    hidden = meta["hidden"]
    vlim = _vmem_limit_bytes()

    # ---------------- Attention + first residual ----------------
    attn_kernel = functools.partial(_attn_kernel, heads_per_group=g, d_head=dh)

    x_spec = pl.BlockSpec((1, L, D), lambda b, gi: (b, 0, 0))
    wg_spec = pl.BlockSpec((1, D, gdh), lambda b, gi: (gi, 0, 0))
    bg_spec = pl.BlockSpec((1, 1, gdh), lambda b, gi: (gi, 0, 0))
    wo_spec = pl.BlockSpec((1, gdh, D), lambda b, gi: (gi, 0, 0))
    bo_spec = pl.BlockSpec((1, D), lambda b, gi: (0, 0))

    add_x = pl.pallas_call(
        attn_kernel,
        out_shape=jax.ShapeDtypeStruct((B, L, D), x.dtype),
        grid_spec=pltpu.PrefetchScalarGridSpec(
            num_scalar_prefetch=0,
            grid=(B, G),
            in_specs=[
                x_spec,
                wg_spec, bg_spec,         # wq, bq (scale folded in)
                wg_spec, bg_spec,         # wk, bk
                wg_spec, bg_spec,         # wv, bv
                wo_spec, bo_spec,         # wo, bo
            ],
            out_specs=x_spec,
            scratch_shapes=[
                pltpu.VMEM((L, D), jnp.float32),     # acc: x + MHA(x)
                pltpu.VMEM((L, gdh), jnp.float32),   # per-group ctx pack
                pltpu.VMEM((L, D), jnp.bfloat16),    # bf16 x (cast once)
            ],
        ),
        compiler_params=pltpu.CompilerParams(
            dimension_semantics=("parallel", "arbitrary"),
            vmem_limit_bytes=vlim,
        ),
    )(x, prep["wq"], prep["bq"], prep["wk"], prep["bk"],
      prep["wv"], prep["bv"], prep["wo"], prep["bo"])

    # ---------------- FeedForward + second residual ----------------
    rows = B * L
    flat = add_x.reshape(rows, D)
    tr = rows
    for cand in (512, 256, 128, 64, 32, 16, 8):
        if cand <= rows and rows % cand == 0:
            tr = cand
            break
    # TODO(synk): for very large `hidden`, add a reduction axis tiling w1/w2's
    # hidden dim instead of holding both full weights in VMEM.
    row_spec = pl.BlockSpec((tr, D), lambda i: (i, 0))

    out = pl.pallas_call(
        _ffn_kernel,
        out_shape=jax.ShapeDtypeStruct((rows, D), x.dtype),
        grid_spec=pltpu.PrefetchScalarGridSpec(
            num_scalar_prefetch=0,
            grid=(rows // tr,),
            in_specs=[
                row_spec,
                pl.BlockSpec((D, hidden), lambda i: (0, 0)),   # w1 (D,hidden)
                pl.BlockSpec((1, hidden), lambda i: (0, 0)),   # b1
                pl.BlockSpec((hidden, D), lambda i: (0, 0)),   # w2 (hidden,D)
                pl.BlockSpec((1, D), lambda i: (0, 0)),        # b2
            ],
            out_specs=row_spec,
        ),
        compiler_params=pltpu.CompilerParams(
            dimension_semantics=("parallel",),
            vmem_limit_bytes=vlim,
        ),
    )(flat, prep["w1"], prep["b1"], prep["w2"], prep["b2"])

    return out.reshape(B, L, D)


# --------------------------------------------------------------------------
# Pure-JAX f32 reference matching the PyTorch EncoderLayer (mask=None)
# --------------------------------------------------------------------------
def _reference_encoder_layer(x, params, n_head: int):
    B, L, D = x.shape
    dh = D // n_head

    def lin(t, w, b):
        return t @ w.T + b

    q = lin(x, params["wq"], params["bq"])
    k = lin(x, params["wk"], params["bk"])
    v = lin(x, params["wv"], params["bv"])

    def split(t):
        return t.reshape(B, L, n_head, dh).transpose(0, 2, 1, 3)

    sq, sk, sv = split(q), split(k), split(v)
    score = jnp.einsum("bhld,bhmd->bhlm", sq, sk) / math.sqrt(dh)
    p = jax.nn.softmax(score, axis=-1)
    ctx = jnp.einsum("bhlm,bhmd->bhld", p, sv)
    ctx = ctx.transpose(0, 2, 1, 3).reshape(B, L, D)
    attn_x = lin(ctx, params["wo"], params["bo"])
    add_x = x + attn_x
    h1 = jax.nn.gelu(lin(add_x, params["w1"], params["b1"]), approximate=False)
    ffn_x = lin(h1, params["w2"], params["b2"])
    return ffn_x + add_x


if __name__ == "__main__":
    B, L, D, H, HID = 2, 8, 32, 4, 64   # batch, seq, d_model, n_head, ffn_hidden

    key = jax.random.PRNGKey(0)
    ks = jax.random.split(key, 13)
    s_d = 1.0 / math.sqrt(D)
    s_h = 1.0 / math.sqrt(HID)

    def u(k, shape, s):
        return jax.random.uniform(k, shape, jnp.float32, -s, s)

    params = {
        "wq": u(ks[0], (D, D), s_d), "bq": u(ks[1], (D,), s_d),
        "wk": u(ks[2], (D, D), s_d), "bk": u(ks[3], (D,), s_d),
        "wv": u(ks[4], (D, D), s_d), "bv": u(ks[5], (D,), s_d),
        "wo": u(ks[6], (D, D), s_d), "bo": u(ks[7], (D,), s_d),
        "w1": u(ks[8], (HID, D), s_d), "b1": u(ks[9], (HID,), s_d),
        "w2": u(ks[10], (D, HID), s_h), "b2": u(ks[11], (D,), s_h),
    }
    x = jax.random.normal(ks[12], (B, L, D), jnp.float32)

    prep, meta = prepare_encoder_params(params, n_head=H)   # one-time prep
    out = encoder_layer_forward(x, prep, meta, s_mask=None)
    out = jax.block_until_ready(out)

    ref = _reference_encoder_layer(x, params, n_head=H)
    assert out.shape == (B, L, D)
    max_err = float(jnp.max(jnp.abs(out - ref)))
    assert jnp.allclose(out, ref, atol=5e-2, rtol=5e-2), (
        f"mismatch vs reference (max abs err {max_err})")

    print("KERNEL_OK")
</pallas_src>

<mosaic_0001>
module attributes {stable_mosaic.version = 11 : i64} {
  func.func @_attn_kernel(%arg0: i32, %arg1: i32, %arg2: memref<1x8x32xf32, #tpu.memory_space<vmem>>, %arg3: memref<1x32x32xbf16, #tpu.memory_space<vmem>>, %arg4: memref<1x1x32xf32, #tpu.memory_space<vmem>>, %arg5: memref<1x32x32xbf16, #tpu.memory_space<vmem>>, %arg6: memref<1x1x32xf32, #tpu.memory_space<vmem>>, %arg7: memref<1x32x32xbf16, #tpu.memory_space<vmem>>, %arg8: memref<1x1x32xf32, #tpu.memory_space<vmem>>, %arg9: memref<1x32x32xbf16, #tpu.memory_space<vmem>>, %arg10: memref<1x32xf32, #tpu.memory_space<vmem>>, %arg11: memref<1x8x32xf32, #tpu.memory_space<vmem>>, %arg12: memref<8x32xf32, #tpu.memory_space<vmem>>, %arg13: memref<8x32xf32, #tpu.memory_space<vmem>>, %arg14: memref<8x32xbf16, #tpu.memory_space<vmem>>) attributes {dimension_semantics = [#tpu.dimension_semantics<parallel>, #tpu.dimension_semantics<arbitrary>], iteration_bounds = array<i64: 2, 1>, scalar_prefetch = 0 : i64, scratch_operands = 3 : i64, tpu.core_type = #tpu.core_type<tc>, window_params = [{transform_indices = @transform_0, window_bounds = array<i64: 1, 8, 32>}, {transform_indices = @transform_1, window_bounds = array<i64: 1, 32, 32>}, {transform_indices = @transform_2, window_bounds = array<i64: 1, 1, 32>}, {transform_indices = @transform_3, window_bounds = array<i64: 1, 32, 32>}, {transform_indices = @transform_4, window_bounds = array<i64: 1, 1, 32>}, {transform_indices = @transform_5, window_bounds = array<i64: 1, 32, 32>}, {transform_indices = @transform_6, window_bounds = array<i64: 1, 1, 32>}, {transform_indices = @transform_7, window_bounds = array<i64: 1, 32, 32>}, {pipeline_mode = #tpu.pipeline_mode<synchronous>, transform_indices = @transform_8, window_bounds = array<i64: 1, 32>}, {transform_indices = @transform_9, window_bounds = array<i64: 1, 8, 32>}]} {
    %c0_i32 = arith.constant 0 : i32
    %0 = arith.cmpi eq, %arg1, %c0_i32 : i32
    %1 = arith.extui %0 : i1 to i32
    %c0_i32_0 = arith.constant 0 : i32
    %2 = arith.cmpi ne, %1, %c0_i32_0 : i32
    scf.if %2 {
      %c0_55 = arith.constant 0 : index
      %c0_56 = arith.constant 0 : index
      %c0_57 = arith.constant 0 : index
      %107 = vector.load %arg2[%c0_55, %c0_56, %c0_57] : memref<1x8x32xf32, #tpu.memory_space<vmem>>, vector<1x8x32xf32>
      %108 = vector.shape_cast %107 : vector<1x8x32xf32> to vector<8x32xf32>
      %109 = arith.truncf %108 : vector<8x32xf32> to vector<8x32xbf16>
      %c0_58 = arith.constant 0 : index
      %c0_59 = arith.constant 0 : index
      %110 = vector.load %arg14[%c0_58, %c0_59] : memref<8x32xbf16, #tpu.memory_space<vmem>>, vector<8x32xbf16>
      tpu.vector_store %arg14[%c0_58, %c0_59], %109 {strides = array<i32>} : memref<8x32xbf16, #tpu.memory_space<vmem>>, vector<8x32xbf16>,
      %c0_60 = arith.constant 0 : index
      %c0_61 = arith.constant 0 : index
      %111 = vector.load %arg10[%c0_60, %c0_61] : memref<1x32xf32, #tpu.memory_space<vmem>>, vector<1x32xf32>
      %112 = vector.broadcast %111 : vector<1x32xf32> to vector<8x32xf32>
      %113 = arith.addf %108, %112 : vector<8x32xf32>
      %c0_62 = arith.constant 0 : index
      %c0_63 = arith.constant 0 : index
      %114 = vector.load %arg12[%c0_62, %c0_63] : memref<8x32xf32, #tpu.memory_space<vmem>>, vector<8x32xf32>
      tpu.vector_store %arg12[%c0_62, %c0_63], %113 {strides = array<i32>} : memref<8x32xf32, #tpu.memory_space<vmem>>, vector<8x32xf32>,
    } else {
    }
    %c0 = arith.constant 0 : index
    %c0_1 = arith.constant 0 : index
    %3 = vector.load %arg14[%c0, %c0_1] : memref<8x32xbf16, #tpu.memory_space<vmem>>, vector<8x32xbf16>
    %c0_2 = arith.constant 0 : index
    %c0_3 = arith.constant 0 : index
    %c0_4 = arith.constant 0 : index
    %4 = vector.load %arg3[%c0_2, %c0_3, %c0_4] : memref<1x32x32xbf16, #tpu.memory_space<vmem>>, vector<1x32x32xbf16>
    %5 = vector.shape_cast %4 : vector<1x32x32xbf16> to vector<32x32xbf16>
    %cst = arith.constant dense<0.000000e+00> : vector<8x32xf32>
    %6 = tpu.matmul %3, %5, %cst {dimension_numbers = #tpu.dot_dimension_numbers<[1], [0], [0], [1], [0, 0, 1, 1], [], []>} : vector<8x32xbf16>, vector<32x32xbf16>, vector<8x32xf32> -> vector<8x32xf32>
    %c0_5 = arith.constant 0 : index
    %c0_6 = arith.constant 0 : index
    %c0_7 = arith.constant 0 : index
    %7 = vector.load %arg4[%c0_5, %c0_6, %c0_7] : memref<1x1x32xf32, #tpu.memory_space<vmem>>, vector<1x1x32xf32>
    %8 = vector.shape_cast %7 : vector<1x1x32xf32> to vector<1x32xf32>
    %9 = vector.broadcast %8 : vector<1x32xf32> to vector<8x32xf32>
    %10 = arith.addf %6, %9 : vector<8x32xf32>
    %c0_8 = arith.constant 0 : index
    %c0_9 = arith.constant 0 : index
    %c0_10 = arith.constant 0 : index
    %11 = vector.load %arg5[%c0_8, %c0_9, %c0_10] : memref<1x32x32xbf16, #tpu.memory_space<vmem>>, vector<1x32x32xbf16>
    %12 = vector.shape_cast %11 : vector<1x32x32xbf16> to vector<32x32xbf16>
    %cst_11 = arith.constant dense<0.000000e+00> : vector<8x32xf32>
    %13 = tpu.matmul %3, %12, %cst_11 {dimension_numbers = #tpu.dot_dimension_numbers<[1], [0], [0], [1], [0, 0, 1, 1], [], []>} : vector<8x32xbf16>, vector<32x32xbf16>, vector<8x32xf32> -> vector<8x32xf32>
    %c0_12 = arith.constant 0 : index
    %c0_13 = arith.constant 0 : index
    %c0_14 = arith.constant 0 : index
    %14 = vector.load %arg6[%c0_12, %c0_13, %c0_14] : memref<1x1x32xf32, #tpu.memory_space<vmem>>, vector<1x1x32xf32>
    %15 = vector.shape_cast %14 : vector<1x1x32xf32> to vector<1x32xf32>
    %16 = vector.broadcast %15 : vector<1x32xf32> to vector<8x32xf32>
    %17 = arith.addf %13, %16 : vector<8x32xf32>
    %c0_15 = arith.constant 0 : index
    %c0_16 = arith.constant 0 : index
    %c0_17 = arith.constant 0 : index
    %18 = vector.load %arg7[%c0_15, %c0_16, %c0_17] : memref<1x32x32xbf16, #tpu.memory_space<vmem>>, vector<1x32x32xbf16>
    %19 = vector.shape_cast %18 : vector<1x32x32xbf16> to vector<32x32xbf16>
    %cst_18 = arith.constant dense<0.000000e+00> : vector<8x32xf32>
    %20 = tpu.matmul %3, %19, %cst_18 {dimension_numbers = #tpu.dot_dimension_numbers<[1], [0], [0], [1], [0, 0, 1, 1], [], []>} : vector<8x32xbf16>, vector<32x32xbf16>, vector<8x32xf32> -> vector<8x32xf32>
    %c0_19 = arith.constant 0 : index
    %c0_20 = arith.constant 0 : index
    %c0_21 = arith.constant 0 : index
    %21 = vector.load %arg8[%c0_19, %c0_20, %c0_21] : memref<1x1x32xf32, #tpu.memory_space<vmem>>, vector<1x1x32xf32>
    %22 = vector.shape_cast %21 : vector<1x1x32xf32> to vector<1x32xf32>
    %23 = vector.broadcast %22 : vector<1x32xf32> to vector<8x32xf32>
    %24 = arith.addf %20, %23 : vector<8x32xf32>
    %25 = arith.truncf %10 : vector<8x32xf32> to vector<8x32xbf16>
    %26 = arith.truncf %17 : vector<8x32xf32> to vector<8x32xbf16>
    %27 = arith.truncf %24 : vector<8x32xf32> to vector<8x32xbf16>
    %28 = vector.extract_strided_slice %25 {offsets = [0, 0], sizes = [8, 8], strides = [1, 1]} : vector<8x32xbf16> to vector<8x8xbf16>
    %29 = vector.extract_strided_slice %26 {offsets = [0, 0], sizes = [8, 8], strides = [1, 1]} : vector<8x32xbf16> to vector<8x8xbf16>
    %30 = vector.extract_strided_slice %27 {offsets = [0, 0], sizes = [8, 8], strides = [1, 1]} : vector<8x32xbf16> to vector<8x8xbf16>
    %cst_22 = arith.constant dense<0.000000e+00> : vector<8x8xf32>
    %31 = tpu.matmul %28, %29, %cst_22 {dimension_numbers = #tpu.dot_dimension_numbers<[1], [1], [0], [0], [0, 0, 1, 0], [], []>} : vector<8x8xbf16>, vector<8x8xbf16>, vector<8x8xf32> -> vector<8x8xf32>
    %cst_23 = arith.constant dense<0xFF800000> : vector<8xf32>
    %32 = vector.multi_reduction <maximumf>, %31, %cst_23 [1] : vector<8x8xf32> to vector<8xf32>
    %33 = vector.shape_cast %32 : vector<8xf32> to vector<8x1xf32>
    %34 = vector.broadcast %33 : vector<8x1xf32> to vector<8x8xf32>
    %35 = arith.subf %31, %34 : vector<8x8xf32>
    %36 = math.exp %35 : vector<8x8xf32>
    %cst_24 = arith.constant dense<0.000000e+00> : vector<8xf32>
    %37 = vector.multi_reduction <add>, %36, %cst_24 [1] : vector<8x8xf32> to vector<8xf32>
    %38 = vector.shape_cast %37 : vector<8xf32> to vector<8x1xf32>
    %39 = tpu.reciprocal %38 {approx = true} : vector<8x1xf32> -> vector<8x1xf32>
    %40 = vector.broadcast %39 : vector<8x1xf32> to vector<8x8xf32>
    %41 = arith.mulf %36, %40 : vector<8x8xf32>
    %42 = arith.truncf %41 : vector<8x8xf32> to vector<8x8xbf16>
    %cst_25 = arith.constant dense<0.000000e+00> : vector<8x8xf32>
    %43 = tpu.matmul %42, %30, %cst_25 {dimension_numbers = #tpu.dot_dimension_numbers<[1], [0], [0], [1], [0, 0, 1, 1], [], []>} : vector<8x8xbf16>, vector<8x8xbf16>, vector<8x8xf32> -> vector<8x8xf32>
    %c0_26 = arith.constant 0 : index
    %c0_27 = arith.constant 0 : index
    %44 = vector.load %arg13[%c0_26, %c0_27] : memref<8x32xf32, #tpu.memory_space<vmem>>, vector<8x8xf32>
    tpu.vector_store %arg13[%c0_26, %c0_27], %43 {strides = array<i32>} : memref<8x32xf32, #tpu.memory_space<vmem>>, vector<8x8xf32>,
    %45 = vector.extract_strided_slice %25 {offsets = [0, 8], sizes = [8, 8], strides = [1, 1]} : vector<8x32xbf16> to vector<8x8xbf16>
    %46 = vector.extract_strided_slice %26 {offsets = [0, 8], sizes = [8, 8], strides = [1, 1]} : vector<8x32xbf16> to vector<8x8xbf16>
    %47 = vector.extract_strided_slice %27 {offsets = [0, 8], sizes = [8, 8], strides = [1, 1]} : vector<8x32xbf16> to vector<8x8xbf16>
    %cst_28 = arith.constant dense<0.000000e+00> : vector<8x8xf32>
    %48 = tpu.matmul %45, %46, %cst_28 {dimension_numbers = #tpu.dot_dimension_numbers<[1], [1], [0], [0], [0, 0, 1, 0], [], []>} : vector<8x8xbf16>, vector<8x8xbf16>, vector<8x8xf32> -> vector<8x8xf32>
    %cst_29 = arith.constant dense<0xFF800000> : vector<8xf32>
    %49 = vector.multi_reduction <maximumf>, %48, %cst_29 [1] : vector<8x8xf32> to vector<8xf32>
    %50 = vector.shape_cast %49 : vector<8xf32> to vector<8x1xf32>
    %51 = vector.broadcast %50 : vector<8x1xf32> to vector<8x8xf32>
    %52 = arith.subf %48, %51 : vector<8x8xf32>
    %53 = math.exp %52 : vector<8x8xf32>
    %cst_30 = arith.constant dense<0.000000e+00> : vector<8xf32>
    %54 = vector.multi_reduction <add>, %53, %cst_30 [1] : vector<8x8xf32> to vector<8xf32>
    %55 = vector.shape_cast %54 : vector<8xf32> to vector<8x1xf32>
    %56 = tpu.reciprocal %55 {approx = true} : vector<8x1xf32> -> vector<8x1xf32>
    %57 = vector.broadcast %56 : vector<8x1xf32> to vector<8x8xf32>
    %58 = arith.mulf %53, %57 : vector<8x8xf32>
    %59 = arith.truncf %58 : vector<8x8xf32> to vector<8x8xbf16>
    %cst_31 = arith.constant dense<0.000000e+00> : vector<8x8xf32>
    %60 = tpu.matmul %59, %47, %cst_31 {dimension_numbers = #tpu.dot_dimension_numbers<[1], [0], [0], [1], [0, 0, 1, 1], [], []>} : vector<8x8xbf16>, vector<8x8xbf16>, vector<8x8xf32> -> vector<8x8xf32>
    %c0_32 = arith.constant 0 : index
    %c8 = arith.constant 8 : index
    %61 = vector.load %arg13[%c0_32, %c8] : memref<8x32xf32, #tpu.memory_space<vmem>>, vector<8x8xf32>
    tpu.vector_store %arg13[%c0_32, %c8], %60 {strides = array<i32>} : memref<8x32xf32, #tpu.memory_space<vmem>>, vector<8x8xf32>,
    %62 = vector.extract_strided_slice %25 {offsets = [0, 16], sizes = [8, 8], strides = [1, 1]} : vector<8x32xbf16> to vector<8x8xbf16>
    %63 = vector.extract_strided_slice %26 {offsets = [0, 16], sizes = [8, 8], strides = [1, 1]} : vector<8x32xbf16> to vector<8x8xbf16>
    %64 = vector.extract_strided_slice %27 {offsets = [0, 16], sizes = [8, 8], strides = [1, 1]} : vector<8x32xbf16> to vector<8x8xbf16>
    %cst_33 = arith.constant dense<0.000000e+00> : vector<8x8xf32>
    %65 = tpu.matmul %62, %63, %cst_33 {dimension_numbers = #tpu.dot_dimension_numbers<[1], [1], [0], [0], [0, 0, 1, 0], [], []>} : vector<8x8xbf16>, vector<8x8xbf16>, vector<8x8xf32> -> vector<8x8xf32>
    %cst_34 = arith.constant dense<0xFF800000> : vector<8xf32>
    %66 = vector.multi_reduction <maximumf>, %65, %cst_34 [1] : vector<8x8xf32> to vector<8xf32>
    %67 = vector.shape_cast %66 : vector<8xf32> to vector<8x1xf32>
    %68 = vector.broadcast %67 : vector<8x1xf32> to vector<8x8xf32>
    %69 = arith.subf %65, %68 : vector<8x8xf32>
    %70 = math.exp %69 : vector<8x8xf32>
    %cst_35 = arith.constant dense<0.000000e+00> : vector<8xf32>
    %71 = vector.multi_reduction <add>, %70, %cst_35 [1] : vector<8x8xf32> to vector<8xf32>
    %72 = vector.shape_cast %71 : vector<8xf32> to vector<8x1xf32>
    %73 = tpu.reciprocal %72 {approx = true} : vector<8x1xf32> -> vector<8x1xf32>
    %74 = vector.broadcast %73 : vector<8x1xf32> to vector<8x8xf32>
    %75 = arith.mulf %70, %74 : vector<8x8xf32>
    %76 = arith.truncf %75 : vector<8x8xf32> to vector<8x8xbf16>
    %cst_36 = arith.constant dense<0.000000e+00> : vector<8x8xf32>
    %77 = tpu.matmul %76, %64, %cst_36 {dimension_numbers = #tpu.dot_dimension_numbers<[1], [0], [0], [1], [0, 0, 1, 1], [], []>} : vector<8x8xbf16>, vector<8x8xbf16>, vector<8x8xf32> -> vector<8x8xf32>
    %c0_37 = arith.constant 0 : index
    %c16 = arith.constant 16 : index
    %78 = vector.load %arg13[%c0_37, %c16] : memref<8x32xf32, #tpu.memory_space<vmem>>, vector<8x8xf32>
    tpu.vector_store %arg13[%c0_37, %c16], %77 {strides = array<i32>} : memref<8x32xf32, #tpu.memory_space<vmem>>, vector<8x8xf32>,
    %79 = vector.extract_strided_slice %25 {offsets = [0, 24], sizes = [8, 8], strides = [1, 1]} : vector<8x32xbf16> to vector<8x8xbf16>
    %80 = vector.extract_strided_slice %26 {offsets = [0, 24], sizes = [8, 8], strides = [1, 1]} : vector<8x32xbf16> to vector<8x8xbf16>
    %81 = vector.extract_strided_slice %27 {offsets = [0, 24], sizes = [8, 8], strides = [1, 1]} : vector<8x32xbf16> to vector<8x8xbf16>
    %cst_38 = arith.constant dense<0.000000e+00> : vector<8x8xf32>
    %82 = tpu.matmul %79, %80, %cst_38 {dimension_numbers = #tpu.dot_dimension_numbers<[1], [1], [0], [0], [0, 0, 1, 0], [], []>} : vector<8x8xbf16>, vector<8x8xbf16>, vector<8x8xf32> -> vector<8x8xf32>
    %cst_39 = arith.constant dense<0xFF800000> : vector<8xf32>
    %83 = vector.multi_reduction <maximumf>, %82, %cst_39 [1] : vector<8x8xf32> to vector<8xf32>
    %84 = vector.shape_cast %83 : vector<8xf32> to vector<8x1xf32>
    %85 = vector.broadcast %84 : vector<8x1xf32> to vector<8x8xf32>
    %86 = arith.subf %82, %85 : vector<8x8xf32>
    %87 = math.exp %86 : vector<8x8xf32>
    %cst_40 = arith.constant dense<0.000000e+00> : vector<8xf32>
    %88 = vector.multi_reduction <add>, %87, %cst_40 [1] : vector<8x8xf32> to vector<8xf32>
    %89 = vector.shape_cast %88 : vector<8xf32> to vector<8x1xf32>
    %90 = tpu.reciprocal %89 {approx = true} : vector<8x1xf32> -> vector<8x1xf32>
    %91 = vector.broadcast %90 : vector<8x1xf32> to vector<8x8xf32>
    %92 = arith.mulf %87, %91 : vector<8x8xf32>
    %93 = arith.truncf %92 : vector<8x8xf32> to vector<8x8xbf16>
    %cst_41 = arith.constant dense<0.000000e+00> : vector<8x8xf32>
    %94 = tpu.matmul %93, %81, %cst_41 {dimension_numbers = #tpu.dot_dimension_numbers<[1], [0], [0], [1], [0, 0, 1, 1], [], []>} : vector<8x8xbf16>, vector<8x8xbf16>, vector<8x8xf32> -> vector<8x8xf32>
    %c0_42 = arith.constant 0 : index
    %c24 = arith.constant 24 : index
    %95 = vector.load %arg13[%c0_42, %c24] : memref<8x32xf32, #tpu.memory_space<vmem>>, vector<8x8xf32>
    tpu.vector_store %arg13[%c0_42, %c24], %94 {strides = array<i32>} : memref<8x32xf32, #tpu.memory_space<vmem>>, vector<8x8xf32>,
    %c0_43 = arith.constant 0 : index
    %c0_44 = arith.constant 0 : index
    %96 = vector.load %arg12[%c0_43, %c0_44] : memref<8x32xf32, #tpu.memory_space<vmem>>, vector<8x32xf32>
    %c0_45 = arith.constant 0 : index
    %c0_46 = arith.constant 0 : index
    %97 = vector.load %arg13[%c0_45, %c0_46] : memref<8x32xf32, #tpu.memory_space<vmem>>, vector<8x32xf32>
    %98 = arith.truncf %97 : vector<8x32xf32> to vector<8x32xbf16>
    %c0_47 = arith.constant 0 : index
    %c0_48 = arith.constant 0 : index
    %c0_49 = arith.constant 0 : index
    %99 = vector.load %arg9[%c0_47, %c0_48, %c0_49] : memref<1x32x32xbf16, #tpu.memory_space<vmem>>, vector<1x32x32xbf16>
    %100 = vector.shape_cast %99 : vector<1x32x32xbf16> to vector<32x32xbf16>
    %cst_50 = arith.constant dense<0.000000e+00> : vector<8x32xf32>
    %101 = tpu.matmul %98, %100, %cst_50 {dimension_numbers = #tpu.dot_dimension_numbers<[1], [0], [0], [1], [0, 0, 1, 1], [], []>} : vector<8x32xbf16>, vector<32x32xbf16>, vector<8x32xf32> -> vector<8x32xf32>
    %102 = arith.addf %96, %101 : vector<8x32xf32>
    %c0_51 = arith.constant 0 : index
    %c0_52 = arith.constant 0 : index
    %103 = vector.load %arg12[%c0_51, %c0_52] : memref<8x32xf32, #tpu.memory_space<vmem>>, vector<8x32xf32>
    tpu.vector_store %arg12[%c0_51, %c0_52], %102 {strides = array<i32>} : memref<8x32xf32, #tpu.memory_space<vmem>>, vector<8x32xf32>,
    %c0_i32_53 = arith.constant 0 : i32
    %104 = arith.cmpi eq, %arg1, %c0_i32_53 : i32
    %105 = arith.extui %104 : i1 to i32
    %c0_i32_54 = arith.constant 0 : i32
    %106 = arith.cmpi ne, %105, %c0_i32_54 : i32
    scf.if %106 {
      %c0_55 = arith.constant 0 : index
      %c0_56 = arith.constant 0 : index
      %107 = vector.load %arg12[%c0_55, %c0_56] : memref<8x32xf32, #tpu.memory_space<vmem>>, vector<8x32xf32>
      %c0_57 = arith.constant 0 : index
      %c0_58 = arith.constant 0 : index
      %c0_59 = arith.constant 0 : index
      %108 = vector.load %arg11[%c0_57, %c0_58, %c0_59] : memref<1x8x32xf32, #tpu.memory_space<vmem>>, vector<1x8x32xf32>
      %109 = vector.shape_cast %108 : vector<1x8x32xf32> to vector<8x32xf32>
      %110 = vector.shape_cast %107 : vector<8x32xf32> to vector<1x8x32xf32>
      tpu.vector_store %arg11[%c0_57, %c0_58, %c0_59], %110 {strides = array<i32>} : memref<1x8x32xf32, #tpu.memory_space<vmem>>, vector<1x8x32xf32>,
    } else {
    }
    return
  }
  func.func @transform_0(%arg0: i32, %arg1: i32) -> (i32, i32, i32) {
    %c0_i32 = arith.constant 0 : i32
    %c0_i32_0 = arith.constant 0 : i32
    %c0_i32_1 = arith.constant 0 : i32
    return %arg0, %c0_i32, %c0_i32_0 : i32, i32, i32
  }
  func.func @transform_1(%arg0: i32, %arg1: i32) -> (i32, i32, i32) {
    %c0_i32 = arith.constant 0 : i32
    %c0_i32_0 = arith.constant 0 : i32
    %c0_i32_1 = arith.constant 0 : i32
    return %arg1, %c0_i32, %c0_i32_0 : i32, i32, i32
  }
  func.func @transform_2(%arg0: i32, %arg1: i32) -> (i32, i32, i32) {
    %c0_i32 = arith.constant 0 : i32
    %c0_i32_0 = arith.constant 0 : i32
    %c0_i32_1 = arith.constant 0 : i32
    return %arg1, %c0_i32, %c0_i32_0 : i32, i32, i32
  }
  func.func @transform_3(%arg0: i32, %arg1: i32) -> (i32, i32, i32) {
    %c0_i32 = arith.constant 0 : i32
    %c0_i32_0 = arith.constant 0 : i32
    %c0_i32_1 = arith.constant 0 : i32
    return %arg1, %c0_i32, %c0_i32_0 : i32, i32, i32
  }
  func.func @transform_4(%arg0: i32, %arg1: i32) -> (i32, i32, i32) {
    %c0_i32 = arith.constant 0 : i32
    %c0_i32_0 = arith.constant 0 : i32
    %c0_i32_1 = arith.constant 0 : i32
    return %arg1, %c0_i32, %c0_i32_0 : i32, i32, i32
  }
  func.func @transform_5(%arg0: i32, %arg1: i32) -> (i32, i32, i32) {
    %c0_i32 = arith.constant 0 : i32
    %c0_i32_0 = arith.constant 0 : i32
    %c0_i32_1 = arith.constant 0 : i32
    return %arg1, %c0_i32, %c0_i32_0 : i32, i32, i32
  }
  func.func @transform_6(%arg0: i32, %arg1: i32) -> (i32, i32, i32) {
    %c0_i32 = arith.constant 0 : i32
    %c0_i32_0 = arith.constant 0 : i32
    %c0_i32_1 = arith.constant 0 : i32
    return %arg1, %c0_i32, %c0_i32_0 : i32, i32, i32
  }
  func.func @transform_7(%arg0: i32, %arg1: i32) -> (i32, i32, i32) {
    %c0_i32 = arith.constant 0 : i32
    %c0_i32_0 = arith.constant 0 : i32
    %c0_i32_1 = arith.constant 0 : i32
    return %arg1, %c0_i32, %c0_i32_0 : i32, i32, i32
  }
  func.func @transform_8(%arg0: i32, %arg1: i32) -> (i32, i32) {
    %c0_i32 = arith.constant 0 : i32
    %c0_i32_0 = arith.constant 0 : i32
    %c0_i32_1 = arith.constant 0 : i32
    return %c0_i32, %c0_i32_0 : i32, i32
  }
  func.func @transform_9(%arg0: i32, %arg1: i32) -> (i32, i32, i32) {
    %c0_i32 = arith.constant 0 : i32
    %c0_i32_0 = arith.constant 0 : i32
    %c0_i32_1 = arith.constant 0 : i32
    return %arg0, %c0_i32, %c0_i32_0 : i32, i32, i32
  }
}

</mosaic_0001>

<bundles_post_ra>
// kernel: tpu_custom_call.1
= control target key start
LH: loop header
LB: loop body
LE: loop exit
PB: predicated region body
PF: predicated region fallthrough
CT: control target
= control target key end

     0   :  { %s2356_s0 = inlined_call_operand.hbm [shape: f32[2,8,32], index: 0, kind: input, shape index: {}]   ;;  %s2357_s1 = inlined_call_operand.hbm [shape: bf16[1,32,32], index: 1, kind: input, shape index: {}]   ;;  %s2358_s2 = inlined_call_operand.vmem [shape: f32[1,1,32], index: 2, kind: input, shape index: {}]   ;;  %s2359_s3 = inlined_call_operand.hbm [shape: bf16[1,32,32], index: 3, kind: input, shape index: {}]   ;;  %s2360_s4 = inlined_call_operand.vmem [shape: f32[1,1,32], index: 4, kind: input, shape index: {}]   ;;  %s2361_s5 = inlined_call_operand.vmem [shape: bf16[1,32,32], index: 5, kind: input, shape index: {}]   ;;  %s2362_s6 = inlined_call_operand.vmem [shape: f32[1,1,32], index: 6, kind: input, shape index: {}]   ;;  %s2363_s7 = inlined_call_operand.hbm [shape: bf16[1,32,32], index: 7, kind: input, shape index: {}]   ;;  %s2364_s8 = inlined_call_operand.vmem [shape: f32[1,32], index: 8, kind: input, shape index: {}]   ;;  %s2365_s9 = inlined_call_operand.hbm [shape: f32[2,8,32], index: 9, kind: output, shape index: {}]  }
   0x1   :  { %2373 = sst [smem:[#allocation21_spill]] %s2362_s6 }
   0x2   :  { %2374 = sst [smem:[#allocation22_spill]] %s2364_s8 }
   0x3   :  { %2375 = sst [smem:[#allocation23_spill]] %s2365_s9 }
   0x4   :  { %14 = vsyncpa [#allocation6], 0 }
   0x5   :  { %16 = vsyncpa [#allocation6 + $0x1], 0 }
   0x6   :  { %17 = vsyncpa [#allocation9], 0 }
   0x7   :  { %18 = vsyncpa [#allocation12], 0 }
   0x8   :  { %19 = vsyncpa [#allocation7], 0 }
   0x9   :  { %21 = vsyncpa [#allocation7 + $0x1], 0  ;;  %s1964_s30 = smov 0   ;;  %s1966_s10 = smov 0  }
   0xa   :  { %s1968_s11 = smov 0   ;;  %s1970_s12 = smov 0  }
   0xb   :  { %s1972_s13 = smov 0   ;;  %s1974_s14 = smov 0  }
   0xc LB: > { %2376 = sst [smem:[#allocation18_spill]] %s1877_s30  ;;  %s1411_s15 = sadd.s32 4294967295, %s1897_s14   ;;  %s1897_s14 = sphi %s1974_s14, %s27_s14   ;;  %s1893_s13 = sphi %s1972_s13, %s2404_s13   ;;  %s1889_s12 = sphi %s1970_s12, %s2403_s12   ;;  %s1885_s11 = sphi %s1968_s11, %s2402_s11   ;;  %s1881_s10 = sphi %s1966_s10, %s2401_s10   ;;  %s1877_s30 = sphi %s1964_s30, %s2400_s30  }
   0xd   : > { %2377 = sst [smem:[#allocation19_spill]] %s1889_s12  ;;  %s1412_s16 = sadd.s32 4294967294, %s1897_s14  }
   0xe   : > { %p59_p0 = scmp.ne.s32.totalorder %s1881_s10, %s1877_s30  ;;  %p1998_p1 = scmp.eq.s32.totalorder %s1411_s15, 0 }
   0xf   : > { %p2002_p2 = scmp.eq.s32.totalorder %s1411_s15, 1  ;;  %p292_p3 = scmp.eq.s32.totalorder %s1412_s16, 1 }
  0x10   : > { %s2378_s17 = scalar_select %p1998_p1, 1, 0 }
  0x11   : > { %s2379_s18 = scalar_select %p2002_p2, 1, 0 }
  0x12   : > { %p2008_p4 = por %p1998_p1, %p59_p0  ;;  %p1413_p5 = scmp.ge.s32.totalorder %s1897_s14, 1 }
  0x13   : > { %p2013_p6 = por %p292_p3, %p59_p0  ;;  %p299_p7 = scmp.lt.s32.totalorder %s1897_s14, 3 }
  0x14   : > { %s2380_s19 = scalar_select %p2008_p4, 1, 0 }
  0x15   : > { %s2381_s20 = scalar_select %p2013_p6, 1, 0 }
  0x16   : > { %p2018_p8 = pnand %p1413_p5, %p299_p7  ;;  %s1899_s22 = smov [#allocation8]  }
  0x17   : > { %2382 = sst [smem:[#allocation20_spill]] %s2381_s20  ;;  %s314_s23 = sshll.u32 %s1899_s22, 4  ;;  %s2022_s23 = int_to_ptr.vmem [resolvable:$true] %s314_s23 }
  0x18   : > { %s2383_s21 = scalar_select %p2018_p8, 1, 0 }
  0x19   : > { %p1582_p9 = pneg %p2018_p8  ;;  %s1900_s25 = smov [#allocation10]  }
  0x1a   : > { %s336_s26 = sshll.u32 %s1900_s25, 4  ;;  %s1901_s27 = smov [#allocation11]   ;;  %s2033_s26 = int_to_ptr.vmem [resolvable:$true] %s336_s26 }
  0x1b   : > { %p2029_p11 = pnand %p1582_p9, %p1998_p1  ;;  %s2035_s28 = sshll.u32 %s1901_s27, 4  ;;  %s373_s28 = int_to_ptr.vmem [resolvable:$true] %s2035_s28 }
  0x1c   : > { %s1693_s16 = scalar_lea.hbm %s2357_s1, 256 }
  0x1d   : > { %p1694_p12 = scmp.ne.s32.totalorder %s2357_s1, %s1693_s16  ;;  %p2045_p13 = pneg %p2029_p11 }
  0x1e   : > { %p1700_p5 = scmp.lt.u32.totalorder %s1693_s16, %s2357_s1 }
  0x1f   : > { %p1696_p0 = pnand %p2045_p13, %p1694_p12 }
  0x21   : > { %p1697_p3 = pneg %p1696_p0 }
  0x23   : > { %p1702_p7 = pnand %p1700_p5, %p1697_p3 }
  0x25   : > { %1705 = shalt.err (!%p1702_p7)
}
  0x26   : > { %s1706_s20 = scalar_lea.vmem %s2022_s23, 256  ;;  %p1714_p1 = scmp.lt.s32.totalorder %s2022_s23, %s2022_s23 }
  0x27   : > { %p1707_p9 = scmp.ne.s32.totalorder %s2022_s23, %s1706_s20  ;;  %p1715_p4 = scmp.lt.s32.totalorder %s1706_s20, %s1706_s20 }
  0x29   : > { %p1709_p10 = pnand %p1707_p9, %p2045_p13  ;;  %p1716_p12 = por %p1715_p4, %p1714_p1 }
  0x2b   : > { %p1710_p6 = pneg %p1709_p10 }
  0x2d   : > { %p1717_p0 = pnand %p1716_p12, %p1710_p6 }
  0x2f   : > { %1720 = shalt.err (!%p1717_p0)
}
  0x30   : > { %s1902_s29 = smov 64   ;;  %s1903_s15 = smov 4  }
  0x31   : > { %1585 = dma.hbm_to_vmem [thread:$0]  (!%p2029_p11), %s2357_s1, 256, %s2022_s23, [#allocation9], %s1902_s29, %s1902_s29, %s1903_s15  }
  0x32   : > { %s1721_s20 = scalar_lea.hbm %s2359_s3, 256 }
  0x33   : > { %p1722_p1 = scmp.ne.s32.totalorder %s2359_s3, %s1721_s20  ;;  %p1728_p10 = scmp.lt.u32.totalorder %s1721_s20, %s2359_s3 }
  0x35   : > { %p1724_p4 = pnand %p1722_p1, %p2045_p13 }
  0x37   : > { %p1725_p6 = pneg %p1724_p4 }
  0x39   : > { %p1730_p3 = pnand %p1728_p10, %p1725_p6 }
  0x3b   : > { %1733 = shalt.err (!%p1730_p3)
}
  0x3c   : > { %s1734_s23 = scalar_lea.vmem %s2033_s26, 256  ;;  %p1742_p12 = scmp.lt.s32.totalorder %s2033_s26, %s2033_s26 }
  0x3d   : > { %p1735_p5 = scmp.ne.s32.totalorder %s2033_s26, %s1734_s23  ;;  %p1743_p0 = scmp.lt.s32.totalorder %s1734_s23, %s1734_s23 }
  0x3f   : > { %p1737_p7 = pnand %p1735_p5, %p2045_p13  ;;  %p1744_p1 = por %p1743_p0, %p1742_p12 }
  0x41   : > { %p1738_p9 = pneg %p1737_p7 }
  0x43   : > { %p1745_p4 = pnand %p1744_p1, %p1738_p9 }
  0x45   : > { %1748 = shalt.err (!%p1745_p4)
}
  0x46   : > { %1588 = dma.hbm_to_vmem [thread:$0]  (!%p2029_p11), %s2359_s3, 256, %s2033_s26, [#allocation9], %s1902_s29, %s1902_s29, %s1903_s15  }
  0x47   : > { %s1749_s16 = scalar_lea.hbm %s2363_s7, 256 }
  0x48   : > { %p1750_p6 = scmp.ne.s32.totalorder %s2363_s7, %s1749_s16  ;;  %p1756_p5 = scmp.lt.u32.totalorder %s1749_s16, %s2363_s7 }
  0x4a   : > { %p1752_p10 = pnand %p1750_p6, %p2045_p13 }
  0x4c   : > { %p1753_p3 = pneg %p1752_p10 }
  0x4e   : > { %p1758_p7 = pnand %p1756_p5, %p1753_p3 }
  0x50   : > { %1761 = shalt.err (!%p1758_p7)
}
  0x51   : > { %s1762_s23 = scalar_lea.vmem %s373_s28, 256  ;;  %p1770_p1 = scmp.lt.s32.totalorder %s373_s28, %s373_s28 }
  0x52   : > { %p1763_p9 = scmp.ne.s32.totalorder %s373_s28, %s1762_s23  ;;  %p1771_p4 = scmp.lt.s32.totalorder %s1762_s23, %s1762_s23 }
  0x54   : > { %p1765_p12 = pnand %p1763_p9, %p2045_p13  ;;  %p1772_p8 = por %p1771_p4, %p1770_p1 }
  0x56   : > { %p1766_p0 = pneg %p1765_p12 }
  0x58   : > { %p1773_p2 = pnand %p1772_p8, %p1766_p0 }
  0x5a   : > { %1776 = shalt.err (!%p1773_p2)
}
  0x5b   : > { %1591 = dma.hbm_to_vmem [thread:$0]  (!%p2029_p11), %s2363_s7, 256, %s373_s28, [#allocation12], %s1902_s29, %s1902_s29, %s1903_s15  }
  0x5c   : > { %s46_s30 = sadd.s32 1, %s1885_s11  ;;  %s39_s24 = sadd.s32 1, %s1893_s13 }
  0x5d   : > { %p53_p2 = scmp.ne.s32.totalorder %s1885_s11, %s1881_s10  ;;  %p41_p8 = scmp.ge.s32.totalorder %s39_s24, 2 }
  0x5e   : > { %p54_p13 = scmp.eq.s32.totalorder %s1897_s14, 0  ;;  %p2386_p6 = scmp.ne.s32.totalorder %s2379_s18, 0 }
  0x5f   : > { %p1603_p3 = scmp.lt.s32.totalorder %s1897_s14, 2  ;;  %s2406_s24 = smov (%p41_p8, %s39_s24), 0 }
  0x60   : > { %p2124_p10 = por %p2386_p6, %p53_p2  ;;  %p55_p5 = por %p54_p13, %p53_p2 }
  0x61   : > { %s389_s9 = sand.u32 1, %s1885_s11   ;;  %s43_s12 = ssub.s32 %s1893_s13, %s2406_s24 }
  0x62   : > { %p44_p7 = scmp.eq.s32.totalorder %s43_s12, 0  ;;  %s1422_s28 = sshll.u32 %s389_s9, 3 }
  0x63   : > { %s1423_s29 = sshll.u32 %s1893_s13, 7  ;;  %s393_s25 = scalar_lea.vmem [#allocation5], %s1422_s28 }
  0x64   : > { %s2136_s15 = scalar_select %p44_p7, %s1885_s11, %s46_s30  }
  0x65   : > { %s2141_s18 = scalar_lea.hbm %s2356_s0, %s1423_s29  ;;  %s400_s27 = sshll.u32 %s393_s25, 4  ;;  %s2143_s27 = int_to_ptr.vmem [resolvable:$true] %s400_s27 }
  0x66   : > { %p2147_p11 = pnand %p1603_p3, %p55_p5  ;;  %s390_s23 = scalar_lea.sflag [#allocation6], %s389_s9 }
  0x67   : > { %s1777_s26 = scalar_lea.hbm %s2141_s18, 128  ;;  %s1782_s12 = scalar_lea.hbm %s2356_s0, 256 }
  0x68   : > { %p1778_p9 = scmp.ne.s32.totalorder %s2141_s18, %s1777_s26  ;;  %p1779_p12 = pneg %p2147_p11 }
  0x69   : > { %p1783_p4 = scmp.lt.u32.totalorder %s2141_s18, %s2356_s0  ;;  %p1784_p2 = scmp.lt.u32.totalorder %s1782_s12, %s1777_s26 }
  0x6a   : > { %p1780_p0 = pnand %p1779_p12, %p1778_p9  ;;  %p1786_p13 = scmp.lt.u32.totalorder %s1777_s26, %s2141_s18 }
  0x6b   : > { %p1785_p8 = por %p1784_p2, %p1783_p4 }
  0x6c   : > { %p1781_p1 = pneg %p1780_p0 }
  0x6d   : > { %p1787_p6 = por %p1786_p13, %p1785_p8 }
  0x6f   : > { %p1788_p3 = pnand %p1787_p6, %p1781_p1 }
  0x71   : > { %1791 = shalt.err (!%p1788_p3)
}
  0x72   : > { %s1792_s9 = scalar_lea.vmem %s2143_s27, 128  ;;  %s1904_s16 = smov [#allocation5]  }
  0x73   : > { %p1793_p5 = scmp.ne.s32.totalorder %s2143_s27, %s1792_s9  ;;  %s1797_s22 = sshll.u32 %s1904_s16, 4  ;;  %s1798_s22 = int_to_ptr.vmem [resolvable:$false] %s1797_s22 }
  0x74   : > { %s1799_s25 = scalar_lea.vmem %s1798_s22, 256  ;;  %p1800_p0 = scmp.lt.s32.totalorder %s2143_s27, %s1798_s22 }
  0x75   : > { %p1795_p7 = pnand %p1793_p5, %p1779_p12  ;;  %p1801_p4 = scmp.lt.s32.totalorder %s1799_s25, %s1792_s9 }
  0x77   : > { %p1796_p9 = pneg %p1795_p7  ;;  %p1802_p2 = por %p1801_p4, %p1800_p0 }
  0x79   : > { %p1803_p8 = pnand %p1802_p2, %p1796_p9 }
  0x7b   : > { %1806 = shalt.err (!%p1803_p8)
}
  0x7c   : > { %1595 = dma.hbm_to_vmem [thread:$0]  (!%p2147_p11), %s2141_s18, 128, %s2143_s27, %s390_s23  }
  0x7d   : > { %p2389_p1 = scmp.ne.s32.totalorder %s2383_s21, 0 }
  0x7e   : > { %s2179_s26 = sand.u32 (!%p2389_p1), 1, %s1881_s10   ;;  %p2390_p12 = scmp.ne.s32.totalorder (!%p2389_p1), %s2380_s19, 0 }
  0x7f   : > { %409 = sbr.rel (%p2389_p1) target bundleno = 1610 (0x64a), region = 56  ;;  %s1425_s6 = sshll.u32 (!%p2389_p1), %s2179_s26, 3 }
  0x80   : > { %s412_s30 = scalar_lea.sflag (!%p2389_p1), [#allocation6], %s2179_s26  ;;  %s415_s12 = scalar_lea.vmem (!%p2389_p1), [#allocation5], %s1425_s6 }
  0x86   : > { %1860 = dma.done.wait (%p2390_p12), %s412_s30, 128  }
  0x87   : > { %1862 = vsyncadd (%p2390_p12), %s412_s30, 4294967168  ;;  %p2391_p11 = scmp.ne.s32.totalorder %s2378_s17, 0 }
  0x89   : > { %1864 = dma.done.wait (%p2391_p11), [#allocation9], 512  }
  0x8a   : > { %1866 = vsyncadd (%p2391_p11), [#allocation9], 4294966784 }
  0x8b   : > { %1868 = dma.done.wait (%p2391_p11), [#allocation12], 256  }
  0x8c   : > { %1870 = vsyncadd (%p2391_p11), [#allocation12], 4294967040  ;;  %v1905_v0 = vmov 0.0   ;;  %vm1906_vm0 = vmmov 0   ;;  %v1669_v1 = vld [vmem:[#allocation10] sm:$0xff]   ;;  %v1670_v2 = vld [vmem:[#allocation8] sm:$0xff]  }
  0x8d   : > { %1494 = vmatprep.subr.bf16.mxu1 %v1905_v0  ;;  %1486 = vmatprep.subr.bf16.mxu0 %v1905_v0  ;;  %v1671_v3 = vld [vmem:[#allocation10 + $0x8] sm:$0xff]   ;;  %vm497_vm1 = vcmask 257024   ;;  %v1672_v6 = vld [vmem:[#allocation8 + $0x8] sm:$0xff]   ;;  %vm507_vm2 = vcmask 261120   ;;  %vm706_vm3 = vcmask 64512   ;;  %s1907_s27 = smov 112  }
  0x8e   : > { %1498 = vmatprep.mubr.msk.bf16.mxu1 %vm1906_vm0, %v1905_v0  ;;  %1490 = vmatprep.mubr.msk.bf16.mxu0 %vm1906_vm0, %v1905_v0  ;;  %v2204_v4 = vld [vmem:[%s415_s12] sm:$0xff]  ;;  %s1908_s20 = smov 120   ;;  %s1909_s23 = smov 104   ;;  %v1674_v24 = vld [vmem:[%s2361_s5 + $0x8] sm:$0xff]   ;;  %vm768_vm4 = vcmask 1043456   ;;  %vm930_vm5 = vcmask 130112  }
  0x8f   : > { %1495 = vmatpush3.bf16.msra.mxu1 %v1669_v1  ;;  %1487 = vmatpush3.bf16.msra.mxu0 %v1670_v2  ;;  %v496_v5 = vpack.c.bf16 %v2204_v4, %v2204_v4  ;;  %v1435_v8 = vld [vmem:[%s2360_s4] ss:$0 sm:$0xff]  ;;  %s2392_s30 = sld [smem:[#allocation21_spill]]  ;;  %s1910_s12 = smov 8   ;;  %vm1046_vm6 = vcmask 195712   ;;  %vm1162_vm7 = vcmask 261312  }
  0x90   : > { %1496 = vmatprep.subr.bf16.mxu1 %v1905_v0  ;;  %1488 = vmatprep.subr.bf16.mxu0 %v1905_v0  ;;  %v1431_v9 = vld [vmem:[%s2358_s2] ss:$0 sm:$0xff]  ;;  %s1911_s17 = smov 16   ;;  %s2393_s18 = sld [smem:[#allocation22_spill]] }
  0x91   : > { %498 = vst.msk [vmem:[#allocation4] sm:$0xf] %vm497_vm1, %v496_v5  ;;  %v1673_v23 = vld [vmem:[%s2361_s5] sm:$0xff]   ;;  %s475_s28 = scalar_lea.vmem [#allocation13], %s1425_s6  ;;  %s2395_s22 = sld [smem:[#allocation23_spill]] }
  0x92   : > { %s1247_s29 = sshll.u32 %s475_s28, 4  ;;  %s1913_s6 = smov [#allocation13]   ;;  %s2308_s29 = int_to_ptr.vmem [resolvable:$true] %s1247_s29 }
  0x93   : > { %1497 = vmatpush3.bf16.msra.mxu1 %v1671_v3  ;;  %1489 = vmatpush3.bf16.msra.mxu0 %v1672_v6 }
  0x94   : > { %1510 = vmatprep.subr.bf16.mxu1 %v1905_v0  ;;  %1502 = vmatprep.subr.bf16.mxu0 %v1905_v0 }
  0x95   : > { %v1439_v39 = vld [vmem:[%s2392_s30] ss:$0 sm:$0xff]  ;;  %s1234_s30 = scalar_lea.sflag [#allocation7], %s2179_s26 }
  0x98   : > { %v509_v7 = vld [vmem:[#allocation4] sm:$0xf] }
  0x99   : > { %1499 = vmatmul.mubr.msk.bf16.vlgmr.msra.gmra.mrb[0].mxu1 %vm507_vm2, %v509_v7  ;;  %1491 = vmatmul.mubr.msk.bf16.vlgmr.msra.gmra.mrb[0].mxu0 %vm507_vm2, %v509_v7 }
  0x9a   : > { %1512 = vmatprep.mubr.msk.bf16.mxu1 %vm1906_vm0, %v1905_v0  ;;  %1506 = vmatprep.mubr.msk.bf16.mxu0 %vm1906_vm0, %v1905_v0 }
  0x9b   : > { %1503 = vmatpush3.bf16.msra.mxu0 %v1673_v23 }
  0x9c   : > { %1504 = vmatprep.subr.bf16.mxu0 %v1905_v0 }
  0x9f   : > { %1505 = vmatpush3.bf16.msra.mxu0 %v1674_v24 }
  0xa0   : > { %1516 = vmatprep.subr.bf16.mxu0 %v1905_v0 }
  0xa2   : > { %1507 = vmatmul.mubr.msk.bf16.vlgmr.msra.gmra.mrb[4].mxu0 %vm507_vm2, %v509_v7 }
  0xa3   : > { %1518 = vmatprep.mubr.msk.bf16.mxu0 %vm1906_vm0, %v1905_v0 }
 0x16c   : > { %v634_v10 = vpop.f32.mrb[0].mxu1  ;;  %v571_v11 = vpop.f32.mrb[0].mxu0 }
 0x16d   : > { %v635_v12 = vadd.f32 %v1435_v8, %v634_v10  ;;  %v1500_v13 = vpop.f32.mrb[1].mxu1  ;;  %v572_v14 = vadd.f32 %v1431_v9, %v571_v11  ;;  %v1492_v15 = vpop.f32.mrb[1].mxu0 }
 0x16e   : > { %v637_v16 = vpop.f32.mrb[2].mxu1  ;;  %v574_v17 = vpop.f32.mrb[2].mxu0 }
 0x16f   : > { %v704_v18 = vpack.c.bf16 %v635_v12, %v635_v12  ;;  %v1501_v19 = vpop.f32.mrb[3].mxu1  ;;  %v1493_v20 = vpop.f32.mrb[3].mxu0  ;;  %v703_v21 = vpack.c.bf16 %v572_v14, %v572_v14 }
 0x171   : > { %934 = vrot.lane.b32.xlu1 %v704_v18, %s1907_s27  ;;  %817 = vrot.lane.b32.xlu0 %v704_v18, %s1908_s20  ;;  %v711_v22 = vsel %vm706_vm3, %v704_v18, 0 }
 0x172   : > { %1511 = vmatpush3.bf16.xpose.msra.mxu1 %v711_v22 }
 0x173   : > { %1522 = vmatprep.subr.bf16.mxu1 %v1905_v0 }
 0x175   : > { %932 = vrot.lane.b32.xlu1 %v703_v21, %s1907_s27  ;;  %814 = vrot.lane.b32.xlu0 %v703_v21, %s1908_s20  ;;  %v697_v40 = vpop.f32.mrb[4].mxu0 }
 0x176   : > { %v698_v41 = vadd.f32 %v1439_v39, %v697_v40  ;;  %v1508_v42 = vpop.f32.mrb[5].mxu0 }
 0x177   : > { %v700_v43 = vpop.f32.mrb[6].mxu0 }
 0x178   : > { %v705_v44 = vpack.c.bf16 %v698_v41, %v698_v41  ;;  %v1509_v45 = vpop.f32.mrb[7].mxu0 }
 0x179   : > { %1048 = vrot.lane.b32.xlu1 %v703_v21, %s1909_s23  ;;  %1050 = vrot.lane.b32.xlu0 %v704_v18, %s1909_s23 }
 0x17a   : > { %1513 = vmatmul.mubr.msk.bf16.vlgmr.msra.gmra.mrb[4].mxu1 %vm706_vm3, %v703_v21  ;;  %v770_v46 = vsel %vm768_vm4, %v705_v44, 0 }
 0x17b   : > { %1524 = vmatprep.mubr.msk.bf16.mxu1 %vm1906_vm0, %v1905_v0  ;;  %1517 = vmatpush3.bf16.msra.mxu0 %v770_v46 }
 0x17c   : > { %1528 = vmatprep.subr.bf16.mxu0 %v1905_v0 }
 0x1e3   : > { %v818_v25 = vpop.permute.xlu0 %817  ;;  %v935_v27 = vpop.permute.xlu1 %934 }
 0x1e4   : > { %v823_v26 = vsel %vm706_vm3, %v818_v25, 0  ;;  %v940_v29 = vsel %vm706_vm3, %v935_v27, 0 }
 0x1e5   : > { %1523 = vmatpush3.bf16.xpose.msra.mxu1 %v823_v26 }
 0x1e6   : > { %1534 = vmatprep.subr.bf16.mxu1 %v1905_v0 }
 0x1e7   : > { %v815_v28 = vpop.permute.xlu0 %814  ;;  %v933_v31 = vpop.permute.xlu1 %932 }
 0x1eb   : > { %v1051_v30 = vpop.permute.xlu0 %1050  ;;  %v1049_v33 = vpop.permute.xlu1 %1048 }
 0x1ec   : > { %1525 = vmatmul.mubr.msk.bf16.vlgmr.msra.gmra.mrb[8].mxu1 %vm706_vm3, %v815_v28  ;;  %v1056_v32 = vsel %vm706_vm3, %v1051_v30, 0 }
 0x1ed   : > { %1535 = vmatpush3.bf16.xpose.msra.mxu1 %v940_v29  ;;  %1536 = vmatprep.mubr.msk.bf16.mxu1 %vm1906_vm0, %v1905_v0 }
 0x1ee   : > { %1546 = vmatprep.subr.bf16.mxu1 %v1905_v0 }
 0x1f4   : > { %1537 = vmatmul.mubr.msk.bf16.vlgmr.msra.gmra.mrb[12].mxu1 %vm706_vm3, %v933_v31 }
 0x1f5   : > { %1547 = vmatpush3.bf16.xpose.msra.mxu1 %v1056_v32  ;;  %1548 = vmatprep.mubr.msk.bf16.mxu1 %vm1906_vm0, %v1905_v0 }
 0x1f6   : > { %1558 = vmatprep.subr.bf16.mxu1 %v1905_v0 }
 0x1fc   : > { %1549 = vmatmul.mubr.msk.bf16.vlgmr.msra.gmra.mrb[16].mxu1 %vm706_vm3, %v1049_v33 }
 0x1fd   : > { %1562 = vmatprep.mubr.msk.bf16.mxu1 %vm1906_vm0, %v1905_v0 }
 0x24d   : > { %v747_v34 = vpop.f32.mrb[4].mxu1 }
 0x24e   : > { %v1514_v35 = vpop.f32.mrb[5].mxu1  ;;  %v753_v36 = vsel %vm706_vm3, %v747_v34, -inf }
 0x24f   : > { %754 = vmax.xlane.f32.xlu0 %v753_v36  ;;  %v750_v37 = vpop.f32.mrb[6].mxu1 }
 0x250   : > { %v1515_v38 = vpop.f32.mrb[7].mxu1 }
 0x2bf   : > { %v859_v47 = vpop.f32.mrb[8].mxu1 }
 0x2c0   : > { %v1526_v48 = vpop.f32.mrb[9].mxu1  ;;  %v865_v49 = vsel %vm706_vm3, %v859_v47, -inf }
 0x2c1   : > { %866 = vmax.xlane.f32.xlu1 %v865_v49  ;;  %v862_v50 = vpop.f32.mrb[10].mxu1 }
 0x2c2   : > { %v1527_v51 = vpop.f32.mrb[11].mxu1  ;;  %v1675_v50 = vld [vmem:[#allocation11] sm:$0xff]  }
 0x2c3   : > { %1559 = vmatpush3.bf16.msra.mxu1 %v1675_v50  ;;  %v1676_v51 = vld [vmem:[#allocation11 + $0x8] sm:$0xff]  }
 0x2c4   : > { %1560 = vmatprep.subr.bf16.mxu1 %v1905_v0 }
 0x2c7   : > { %v976_v52 = vpop.f32.mrb[12].mxu1  ;;  %1561 = vmatpush3.bf16.msra.mxu1 %v1676_v51 }
 0x2c8   : > { %v1538_v53 = vpop.f32.mrb[13].mxu1  ;;  %v982_v54 = vsel %vm706_vm3, %v976_v52, -inf }
 0x2c9   : > { %983 = vmax.xlane.f32.xlu0 %v982_v54  ;;  %v979_v55 = vpop.f32.mrb[14].mxu1 }
 0x2ca   : > { %v1539_v56 = vpop.f32.mrb[15].mxu1 }
 0x2cb   : > { %v1430_v56 = vld [vmem:[%s2393_s18] ss:$0 sm:$0xff] }
 0x2cf   : > { %v1092_v57 = vpop.f32.mrb[16].mxu1 }
 0x2d0   : > { %v1550_v58 = vpop.f32.mrb[17].mxu1  ;;  %v1098_v59 = vsel %vm706_vm3, %v1092_v57, -inf }
 0x2d1   : > { %1099 = vmax.xlane.f32.xlu0 %v1098_v59  ;;  %v1095_v60 = vpop.f32.mrb[18].mxu1 }
 0x2d2   : > { %v1551_v61 = vpop.f32.mrb[19].mxu1 }
 0x2dc   : > { %v755_v62 = vpop.xlane.xlu0 %754 }
 0x2dd   : > { %v756_v63 = vsub.f32 %v747_v34, %v755_v62 }
 0x2df   : > { %v757_v1 = vmul.f32 1.442695, %v756_v63 }
 0x2e1   : > { %1677 = vpow2.f32 %v757_v1 }
 0x2eb   : > { %v1678_v2 = vpop.eup %1677 }
 0x2ec   : > { %v759_v3 = vsel %vm706_vm3, %v1678_v2, 0.0 }
 0x2ed   : > { %760 = vadd.xlane.f32.xlu1 %v759_v3 }
 0x2fe   : > { %878 = vrot.lane.b32.xlu1 %v705_v44, %s1908_s20  ;;  %s2394_s20 = sld [smem:[#allocation19_spill]] }
 0x34e   : > { %v867_v5 = vpop.xlane.xlu1 %866 }
 0x34f   : > { %v868_v6 = vsub.f32 %v859_v47, %v867_v5 }
 0x351   : > { %v869_v7 = vmul.f32 1.442695, %v868_v6 }
 0x353   : > { %1679 = vpow2.f32 %v869_v7 }
 0x356   : > { %v984_v8 = vpop.xlane.xlu0 %983 }
 0x357   : > { %v985_v9 = vsub.f32 %v976_v52, %v984_v8 }
 0x359   : > { %v986_v10 = vmul.f32 1.442695, %v985_v9 }
 0x35b   : > { %1681 = vpow2.f32 %v986_v10 }
 0x35d   : > { %v1680_v11 = vpop.eup %1679 }
 0x35e   : > { %v1100_v12 = vpop.xlane.xlu0 %1099  ;;  %v871_v13 = vsel %vm706_vm3, %v1680_v11, 0.0 }
 0x35f   : > { %v1101_v14 = vsub.f32 %v1092_v57, %v1100_v12  ;;  %872 = vadd.xlane.f32.xlu0 %v871_v13  ;;  %v506_v57 = vadd.f32 %v1430_v56, %v2204_v4 }
 0x361   : > { %v1102_v15 = vmul.f32 1.442695, %v1101_v14  ;;  %508 = vst.msk [vmem:[#allocation2] sm:$0xff] %vm507_vm2, %v506_v57 }
 0x363   : > { %1683 = vpow2.f32 %v1102_v15 }
 0x365   : > { %v1682_v16 = vpop.eup %1681 }
 0x366   : > { %v988_v17 = vsel %vm706_vm3, %v1682_v16, 0.0 }
 0x367   : > { %989 = vadd.xlane.f32.xlu1 %v988_v17 }
 0x36d   : > { %v1684_v18 = vpop.eup %1683 }
 0x36e   : > { %v1104_v19 = vsel %vm706_vm3, %v1684_v18, 0.0 }
 0x36f   : > { %1105 = vadd.xlane.f32.xlu0 %v1104_v19 }
 0x378   : > { %1110 = vrot.lane.b32.xlu1 %v705_v44, %s1909_s23  ;;  %s1455_s23 = sshll.u32 %s2394_s20, 7 }
 0x379   : > { %s2306_s25 = scalar_lea.hbm %s2395_s22, %s1455_s23 }
 0x37a   : > { %v761_v20 = vpop.xlane.xlu1 %760 }
 0x37b   : > { %1685 = vrcp.f32 %v761_v20 }
 0x37e   : > { %v879_v22 = vpop.permute.xlu1 %878 }
 0x37f   : > { %v884_v25 = vsel %vm768_vm4, %v879_v22, 0 }
 0x385   : > { %v1686_v21 = vpop.eup %1685  ;;  %994 = vrot.lane.b32.xlu0 %v705_v44, %s1907_s27  ;;  %s1912_s27 = smov 24  }
 0x386   : > { %v763_v23 = vmul.f32 %v1686_v21, %v1678_v2  ;;  %v1164_v2 = vld [vmem:[#allocation2] sm:$0xff] }
 0x388   : > { %v764_v24 = vpack.c.bf16 %v763_v23, %v763_v23 }
 0x38a   : > { %1519 = vmatmul.mubr.msk.bf16.vlgmr.msra.gmra.mrb[8].mxu0 %vm706_vm3, %v764_v24 }
 0x38b   : > { %1529 = vmatpush3.bf16.msra.mxu0 %v884_v25  ;;  %1530 = vmatprep.mubr.msk.bf16.mxu0 %vm1906_vm0, %v1905_v0 }
 0x38c   : > { %1540 = vmatprep.subr.bf16.mxu0 %v1905_v0 }
 0x3ec   : > { %v873_v26 = vpop.xlane.xlu0 %872 }
 0x3ed   : > { %1687 = vrcp.f32 %v873_v26 }
 0x3f4   : > { %v990_v27 = vpop.xlane.xlu1 %989 }
 0x3f5   : > { %1689 = vrcp.f32 %v990_v27 }
 0x3f7   : > { %v1688_v28 = vpop.eup %1687 }
 0x3f8   : > { %v875_v29 = vmul.f32 %v1688_v28, %v1680_v11  ;;  %v1111_v36 = vpop.permute.xlu1 %1110 }
 0x3f9   : > { %v1116_v38 = vsel %vm768_vm4, %v1111_v36, 0 }
 0x3fa   : > { %v876_v30 = vpack.c.bf16 %v875_v29, %v875_v29 }
 0x3fc   : > { %v1106_v31 = vpop.xlane.xlu0 %1105  ;;  %1531 = vmatmul.mubr.msk.bf16.vlgmr.msra.gmra.mrb[12].mxu0 %vm706_vm3, %v876_v30 }
 0x3fd   : > { %1691 = vrcp.f32 %v1106_v31  ;;  %1542 = vmatprep.mubr.msk.bf16.mxu0 %vm1906_vm0, %v1905_v0 }
 0x3ff   : > { %v1690_v32 = vpop.eup %1689 }
 0x400   : > { %v992_v33 = vmul.f32 %v1690_v32, %v1682_v16  ;;  %v995_v34 = vpop.permute.xlu0 %994 }
 0x401   : > { %v1000_v35 = vsel %vm768_vm4, %v995_v34, 0 }
 0x402   : > { %1541 = vmatpush3.bf16.msra.mxu0 %v1000_v35  ;;  %v993_v37 = vpack.c.bf16 %v992_v33, %v992_v33 }
 0x403   : > { %1552 = vmatprep.subr.bf16.mxu0 %v1905_v0 }
 0x405   : > { %1543 = vmatmul.mubr.msk.bf16.vlgmr.msra.gmra.mrb[16].mxu0 %vm706_vm3, %v993_v37 }
 0x406   : > { %1553 = vmatpush3.bf16.msra.mxu0 %v1116_v38  ;;  %1554 = vmatprep.mubr.msk.bf16.mxu0 %vm1906_vm0, %v1905_v0 }
 0x407   : > { %v1692_v39 = vpop.eup %1691 }
 0x408   : > { %v1108_v40 = vmul.f32 %v1692_v39, %v1684_v18 }
 0x40a   : > { %v1109_v41 = vpack.c.bf16 %v1108_v40, %v1108_v40 }
 0x40d   : > { %1555 = vmatmul.mubr.msk.bf16.vlgmr.msra.gmra.mrb[20].mxu0 %vm706_vm3, %v1109_v41 }
 0x45d   : > { %v806_v42 = vpop.f32.mrb[8].mxu0 }
 0x45e   : > { %812 = vst.msk [vmem:[#allocation3] sm:$0xff] %vm706_vm3, %v806_v42  ;;  %v1520_v43 = vpop.f32.mrb[9].mxu0 }
 0x45f   : > { %v809_v44 = vpop.f32.mrb[10].mxu0 }
 0x460   : > { %v1521_v45 = vpop.f32.mrb[11].mxu0 }
 0x4cf   : > { %v920_v46 = vpop.f32.mrb[12].mxu0 }
 0x4d0   : > { %927 = vrot.lane.b32.xlu1 %v920_v46, %s1910_s12  ;;  %v1532_v47 = vpop.f32.mrb[13].mxu0  ;;  %s1807_s12 = scalar_lea.vmem %s2308_s29, 128 }
 0x4d1   : > { %v923_v48 = vpop.f32.mrb[14].mxu0  ;;  %p1808_p13 = scmp.ne.s32.totalorder %s2308_s29, %s1807_s12 }
 0x4d2   : > { %v1533_v49 = vpop.f32.mrb[15].mxu0 }
 0x4d3   : > { %p1809_p6 = pnand %p1808_p13, %p2124_p10 }
 0x4d5   : > { %p1810_p3 = pneg %p1809_p6 }
 0x4d8   : > { %v1036_v52 = vpop.f32.mrb[16].mxu0 }
 0x4d9   : > { %1043 = vrot.lane.b32.xlu0 %v1036_v52, %s1911_s17  ;;  %v1544_v53 = vpop.f32.mrb[17].mxu0  ;;  %s1811_s17 = sshll.u32 %s1913_s6, 4  ;;  %s1812_s17 = int_to_ptr.vmem [resolvable:$false] %s1811_s17 }
 0x4da   : > { %v1039_v54 = vpop.f32.mrb[18].mxu0  ;;  %s1813_s19 = scalar_lea.vmem %s1812_s17, 256  ;;  %p1814_p5 = scmp.lt.s32.totalorder %s2308_s29, %s1812_s17 }
 0x4db   : > { %v1545_v55 = vpop.f32.mrb[19].mxu0  ;;  %p1815_p7 = scmp.lt.s32.totalorder %s1813_s19, %s1807_s12 }
 0x4dd   : > { %p1816_p9 = por %p1815_p7, %p1814_p5 }
 0x4df   : > { %p1817_p0 = pnand %p1816_p9, %p1810_p3 }
 0x4e0   : > { %v1152_v58 = vpop.f32.mrb[20].mxu0 }
 0x4e1   : > { %1159 = vrot.lane.b32.xlu1 %v1152_v58, %s1912_s27  ;;  %v1556_v59 = vpop.f32.mrb[21].mxu0 }
 0x4e2   : > { %v1155_v0 = vpop.f32.mrb[22].mxu0 }
 0x4e3   : > { %v1557_v60 = vpop.f32.mrb[23].mxu0 }
 0x542   : > { %v928_v61 = vpop.permute.xlu1 %927 }
 0x543   : > { %931 = vst.msk [vmem:[#allocation3] sm:$0xff] %vm930_vm5, %v928_v61 }
 0x54b   : > { %v1044_v62 = vpop.permute.xlu0 %1043 }
 0x54c   : > { %1047 = vst.msk [vmem:[#allocation3] sm:$0xff] %vm1046_vm6, %v1044_v62 }
 0x553   : > { %v1160_v63 = vpop.permute.xlu1 %1159 }
 0x554   : > { %1163 = vst.msk [vmem:[#allocation3] sm:$0xff] %vm1162_vm7, %v1160_v63 }
 0x55b   : > { %v1165_v4 = vld [vmem:[#allocation3] sm:$0xff] }
 0x55c   : > { %v1166_v1 = vpack.c.bf16 %v1165_v4, %v1165_v4 }
 0x55e   : > { %1563 = vmatmul.mubr.msk.bf16.vlgmr.msra.gmra.mrb[20].mxu1 %vm507_vm2, %v1166_v1 }
 0x631   : > { %v1220_v3 = vpop.f32.mrb[20].mxu1 }
 0x632   : > { %v1226_v5 = vadd.f32 %v1220_v3, %v1164_v2  ;;  %v1564_v6 = vpop.f32.mrb[21].mxu1 }
 0x633   : > { %v1223_v7 = vpop.f32.mrb[22].mxu1 }
 0x634   : > { %1227 = vst.msk [vmem:[#allocation2] sm:$0xff] %vm507_vm2, %v1226_v5  ;;  %v1565_v8 = vpop.f32.mrb[23].mxu1 }
 0x63b   : > { %v1231_v9 = vld [vmem:[#allocation2] sm:$0xff] }
 0x63c   : > { %1232 = vst.msk [vmem:[%s475_s28] sm:$0xff] %vm507_vm2, %v1231_v9 }
 0x63d   : > { %1820 = shalt.err (!%p1817_p0)
}
 0x63e   : > { %s1821_s26 = scalar_lea.hbm %s2306_s25, 128  ;;  %s1825_s27 = scalar_lea.hbm %s2395_s22, 256 }
 0x63f   : > { %p1822_p4 = scmp.ne.s32.totalorder %s2306_s25, %s1821_s26  ;;  %p1826_p1 = scmp.lt.u32.totalorder %s2306_s25, %s2395_s22 }
 0x640   : > { %p1827_p12 = scmp.lt.u32.totalorder %s1825_s27, %s1821_s26  ;;  %p1829_p13 = scmp.lt.u32.totalorder %s1821_s26, %s2306_s25 }
 0x641   : > { %p1823_p2 = pnand %p1822_p4, %p2124_p10 }
 0x642   : > { %p1828_p11 = por %p1827_p12, %p1826_p1 }
 0x643   : > { %p1824_p8 = pneg %p1823_p2 }
 0x644   : > { %p1830_p6 = por %p1829_p13, %p1828_p11 }
 0x646   : > { %p1831_p3 = pnand %p1830_p6, %p1824_p8 }
 0x648   : > { %1834 = shalt.err (!%p1831_p3)
}
 0x649   : > { %1580 = dma.vmem_to_hbm [thread:$0]  (%p2124_p10), %s2308_s29, 128, %s2306_s25, %s1234_s30  }
 0x64a PF: > { %s2396_s28 = sld [smem:[#allocation18_spill]]  ;;  %s2397_s9 = sld [smem:[#allocation20_spill]] }
 0x64b   : > { %p2399_p7 = scmp.ge.s32.totalorder %s1897_s14, 2 }
 0x650   : > { %s1259_s16 = sand.u32 1, %s2396_s28   ;;  %p2398_p5 = scmp.ne.s32.totalorder %s2397_s9, 0 }
 0x651   : > { %s1260_s12 = scalar_lea.sflag [#allocation7], %s1259_s16 }
 0x652   : > { %p1597_p9 = pnand %p2399_p7, %p2398_p5 }
 0x654   : > { %1872 = dma.done.wait (!%p1597_p9), %s1260_s12, 128  }
 0x655   : > { %1874 = vsyncadd (!%p1597_p9), %s1260_s12, 4294967168  ;;  %s27_s14 = sadd.s32 1, %s1897_s14   ;;  %s2400_s30 = smov %s1881_s10 }
 0x656   : > { %p24_p0 = scmp.ge.s32.totalorder %s27_s14, 4   ;;  %s2401_s10 = smov %s1885_s11 }
 0x657   : > { %s2402_s11 = smov %s2136_s15  ;;  %s2403_s12 = smov %s1893_s13 }
 0x658   : > { %s2404_s13 = smov %s2406_s24  ;;  %26 = sbr.rel (!%p24_p0) target bundleno = 12 (0xc), region = 136 }
 0x65f   :  { %1265 = vsyncpa [#allocation6], 1 }
 0x660   :  { %1267 = vsyncpa [#allocation6 + $0x1], 1 }
 0x661   :  { %1268 = vsyncpa [#allocation9], 1 }
 0x662   :  { %1269 = vsyncpa [#allocation12], 1 }
 0x663   :  { %1270 = vsyncpa [#allocation7], 1 }
 0x664   :  { %1272 = vsyncpa [#allocation7 + $0x1], 1 }

</bundles_post_ra>
